<compile_context>
chip_gen: v6e
topology: v6e:2x2x1
jax: 0.10.0
libtpu: 0.0.40
codegen_flags: <defaults>
</compile_context>

<pallas_src>
import jax
import jax.numpy as jnp
from jax.experimental import pallas as pl
from jax.experimental.pallas import tpu as pltpu

_LANE = 128
_MIB = 1024 * 1024


def _round_up(x, m):
    return (x + m - 1) // m * m


def _linear_classifier_kernel(x_ref, theta_ref, bias_ref, o_ref):
    # x_ref:     [TB, D] (VMEM) streamed batch tile, features on the lane axis
    # theta_ref: [1, D]  (VMEM) pinned (same block index every grid step)
    # bias_ref:  [1, 1]  (SMEM) scalar
    # o_ref:     [1, TB] (VMEM) lane-dense output (batch chunk on lanes)
    s = jax.lax.dot_general(
        theta_ref[...], x_ref[...],
        dimension_numbers=(((1,), (1,)), ((), ())),   # contract over D (Q·Kᵀ-style)
        preferred_element_type=jnp.float32)           # [1, TB] f32 accumulation
    o_ref[...] = jax.nn.sigmoid(s + bias_ref[0, 0]).astype(o_ref.dtype)


def linear_classifier_forward(input_data, theta, bias, *,
                              target_tile_bytes=12 * _MIB,
                              vmem_limit_bytes=48 * _MIB,
                              use_pallas=None):
    """input_data: [B, 1, D], theta: [1, D], bias: [1, 1]  ->  [B] (float32)."""
    B, one, D = input_data.shape
    assert one == 1, "LinearClassifier expects inputData of shape [batch, 1, dim]"

    x = input_data.reshape(B, D)                    # metadata-only reshape, native dtype
    theta_v = theta.reshape(1, D).astype(x.dtype)   # tiny (1 x D) cast so dot dtypes match
    bias_s = bias.reshape(1, 1).astype(jnp.float32)

    itemsize = x.dtype.itemsize
    d_pad = _round_up(D, _LANE)                     # lane padding counts toward VMEM
    bytes_per_row = d_pad * itemsize

    # Batch tile: as many 128-row chunks as fit target_tile_bytes, clamped to the
    # (lane-padded) batch; ensure >= 2 grid steps when possible so v7x's two TCs
    # both get work under dimension_semantics=("parallel",).
    tb = max(_LANE, (target_tile_bytes // bytes_per_row) // _LANE * _LANE)
    tb = min(tb, _round_up(B, _LANE))
    if B >= 2 * _LANE:
        tb = min(tb, _round_up((B + 1) // 2, _LANE))

    # x double-buffer + out double-buffer (8-sublane padded) + theta.
    vmem_needed = 2 * tb * bytes_per_row + 2 * 8 * tb * 4 + 8 * d_pad * itemsize
    tile_fits = vmem_needed <= vmem_limit_bytes

    if use_pallas is None:
        # Tiny problems are pure dispatch overhead for a custom kernel; pathologically
        # wide D (min tile would blow VMEM) also falls back to XLA's fused dot.
        use_pallas = tile_fits and (B * bytes_per_row >= 512 * 1024)

    if not use_pallas:
        res = x.astype(jnp.float32) @ theta_v.reshape(D).astype(jnp.float32) + bias_s[0, 0]
        return jax.nn.sigmoid(res)

    grid_b = pl.cdiv(B, tb)
    b_out = grid_b * tb            # padded output length; pad lanes are sliced off

    out = pl.pallas_call(
        _linear_classifier_kernel,
        out_shape=jax.ShapeDtypeStruct((1, b_out), jnp.float32),
        grid=(grid_b,),
        in_specs=[
            # x: streamed over batch (pipelined, double-buffered HBM->VMEM DMA).
            pl.BlockSpec((tb, D), lambda i: (i, 0)),
            # theta: constant block index -> fetched once, resident in VMEM.
            pl.BlockSpec((1, D), lambda i: (0, 0)),
            # bias: scalar parameter in SMEM.
            pl.BlockSpec(memory_space=pltpu.MemorySpace.SMEM),
        ],
        # Lane-dense output: batch chunk lives on the lane axis.
        out_specs=pl.BlockSpec((1, tb), lambda i: (0, i)),
        compiler_params=pltpu.CompilerParams(
            dimension_semantics=("parallel",),      # shard batch tiles over v7x's 2 TCs
            vmem_limit_bytes=vmem_limit_bytes,
        ),
    )(x, theta_v, bias_s)

    # match torch .squeeze(): -> [B]
    return out[0, :B]


if __name__ == "__main__":
    key = jax.random.PRNGKey(0)
    k_theta, k_bias, k_x = jax.random.split(key, 3)

    B, D = 8, 32                                                      # small synthetic shapes
    theta = jax.random.normal(k_theta, (1, D), dtype=jnp.float32)     # torch.randn([1, dim])
    bias = jax.random.normal(k_bias, (1, 1), dtype=jnp.float32)       # torch.randn([1, 1])
    x = jax.random.normal(k_x, (B, 1, D), dtype=jnp.float32)          # inputData [batch, 1, dim]

    # Force the Pallas path so the kernel itself is exercised at this tiny shape.
    cls = linear_classifier_forward(x, theta, bias, use_pallas=True)
    cls = jax.block_until_ready(cls)

    # sanity check against plain-JAX reference of the same math (exact sigmoid now;
    # tolerance only covers the MXU's multi-pass f32 matmul scheme)
    ref = jax.nn.sigmoid(x.reshape(B, D) @ theta.reshape(D) + bias[0, 0])
    assert cls.shape == (B,)
    err = float(jnp.max(jnp.abs(cls - ref)))
    assert jnp.allclose(cls, ref, atol=1e-4, rtol=1e-4), err

    print("KERNEL_OK")
</pallas_src>

<mosaic_0001>
module attributes {stable_mosaic.version = 11 : i64} {
  func.func @_linear_classifier_kernel(%arg0: i32, %arg1: memref<128x32xf32, #tpu.memory_space<vmem>>, %arg2: memref<1x32xf32, #tpu.memory_space<vmem>>, %arg3: memref<1x1xf32, #tpu.memory_space<smem>>, %arg4: memref<1x128xf32, #tpu.memory_space<vmem>>) attributes {dimension_semantics = [#tpu.dimension_semantics<parallel>], iteration_bounds = array<i64: 1>, scalar_prefetch = 0 : i64, scratch_operands = 0 : i64, tpu.core_type = #tpu.core_type<tc>, window_params = [{transform_indices = @transform_0, window_bounds = array<i64: 128, 32>}, {pipeline_mode = #tpu.pipeline_mode<synchronous>, transform_indices = @transform_1, window_bounds = array<i64: 1, 32>}, {transform_indices = @transform_2, window_bounds = array<i64: 1, 1>}, {transform_indices = @transform_3, window_bounds = array<i64: 1, 128>}]} {
    %c0 = arith.constant 0 : index
    %c0_0 = arith.constant 0 : index
    %0 = vector.load %arg2[%c0, %c0_0] : memref<1x32xf32, #tpu.memory_space<vmem>>, vector<1x32xf32>
    %c0_1 = arith.constant 0 : index
    %c0_2 = arith.constant 0 : index
    %1 = vector.load %arg1[%c0_1, %c0_2] : memref<128x32xf32, #tpu.memory_space<vmem>>, vector<128x32xf32>
    %cst = arith.constant dense<0.000000e+00> : vector<1x128xf32>
    %2 = tpu.matmul %0, %1, %cst {dimension_numbers = #tpu.dot_dimension_numbers<[1], [1], [0], [0], [0, 0, 1, 0], [], []>} : vector<1x32xf32>, vector<128x32xf32>, vector<1x128xf32> -> vector<1x128xf32>
    %c0_3 = arith.constant 0 : index
    %c0_4 = arith.constant 0 : index
    %3 = memref.load %arg3[%c0_3, %c0_4] : memref<1x1xf32, #tpu.memory_space<smem>>
    %4 = vector.broadcast %3 : f32 to vector<1x128xf32>
    %5 = arith.addf %2, %4 : vector<1x128xf32>
    %6 = arith.negf %5 : vector<1x128xf32>
    %7 = math.exp %6 : vector<1x128xf32>
    %cst_5 = arith.constant 1.000000e+00 : f32
    %8 = vector.broadcast %cst_5 : f32 to vector<1x128xf32>
    %9 = arith.addf %8, %7 : vector<1x128xf32>
    %10 = arith.divf %8, %9 : vector<1x128xf32>
    %c0_6 = arith.constant 0 : index
    %c0_7 = arith.constant 0 : index
    %11 = vector.load %arg4[%c0_6, %c0_7] : memref<1x128xf32, #tpu.memory_space<vmem>>, vector<1x128xf32>
    tpu.vector_store %arg4[%c0_6, %c0_7], %10 {strides = array<i32>} : memref<1x128xf32, #tpu.memory_space<vmem>>, vector<1x128xf32>,
    return
  }
  func.func @transform_0(%arg0: i32) -> (i32, i32) {
    %c0_i32 = arith.constant 0 : i32
    %c0_i32_0 = arith.constant 0 : i32
    return %arg0, %c0_i32 : i32, i32
  }
  func.func @transform_1(%arg0: i32) -> (i32, i32) {
    %c0_i32 = arith.constant 0 : i32
    %c0_i32_0 = arith.constant 0 : i32
    %c0_i32_1 = arith.constant 0 : i32
    return %c0_i32, %c0_i32_0 : i32, i32
  }
  func.func @transform_2(%arg0: i32) -> (i32, i32) {
    %c0_i32 = arith.constant 0 : i32
    %c0_i32_0 = arith.constant 0 : i32
    %c0_i32_1 = arith.constant 0 : i32
    return %c0_i32, %c0_i32_0 : i32, i32
  }
  func.func @transform_3(%arg0: i32) -> (i32, i32) {
    %c0_i32 = arith.constant 0 : i32
    %c0_i32_0 = arith.constant 0 : i32
    return %c0_i32, %arg0 : i32, i32
  }
}

</mosaic_0001>

<bundles_post_ra>
// kernel: tpu_custom_call.1
= control target key start
LH: loop header
LB: loop body
LE: loop exit
PB: predicated region body
PF: predicated region fallthrough
CT: control target
= control target key end

     0   :  { %9 = vsyncpa [#allocation4], 0  ;;  %s372_s0 = inlined_call_operand.hbm [shape: f32[8,32], index: 0, kind: input, shape index: {}]   ;;  %s373_s1 = inlined_call_operand.vmem [shape: f32[1,32], index: 1, kind: input, shape index: {}]   ;;  %s374_s2 = inlined_call_operand.<no memory space> [shape: f32[1,1], index: 2, kind: input, shape index: {}]   ;;  %s375_s3 = inlined_call_operand.hbm [shape: f32[1,128], index: 3, kind: output, shape index: {}]  }
   0x1   :  { %10 = vsyncpa [#allocation5], 0 }
   0x2   :  { %15 = vsyncadd [#allocation4], 1920  ;;  %s317_s12 = smov [#allocation3]  }
   0x3   :  { %s16_s13 = sshll.u32 %s317_s12, 4  ;;  %s17_s13 = int_to_ptr.vmem [resolvable:$true] %s16_s13 }
   0x4   :  { %s281_s14 = scalar_lea.vmem %s17_s13, 128  ;;  %s285_s15 = scalar_lea.vmem %s17_s13, 2048 }
   0x5   :  { %p282_p0 = scmp.ne.s32.totalorder %s17_s13, %s281_s14  ;;  %p286_p1 = scmp.lt.s32.totalorder %s17_s13, %s17_s13 }
   0x6   :  { %p287_p2 = scmp.lt.s32.totalorder %s285_s15, %s281_s14 }
   0x8   :  { %p288_p3 = por %p287_p2, %p286_p1 }
   0xa   :  { %p289_p4 = pnand %p288_p3, %p282_p0 }
   0xc   :  { %292 = shalt.err (!%p289_p4)
}
   0xd   :  { %s318_s16 = smov 128   ;;  %s319_s17 = smov 8  }
   0xe   :  { %22 = dma.hbm_to_vmem [thread:$0]  %s372_s0, 128, %s17_s13, [#allocation4], %s318_s16, %s318_s16, %s319_s17  }
   0xf   :  { %313 = dma.done.wait [#allocation4], 2048  }
  0x10   :  { %314 = vsyncadd [#allocation4], 4294965248  ;;  %v320_v0 = vmov 0.0   ;;  %vm321_vm0 = vmmov 0   ;;  %vm49_vm1 = vcmask 261120   ;;  %v46_v1 = vld [vmem:[#allocation3 + $0x78] sm:$0xff]  ;;  %v48_v18 = vstv %s374_s2 }
  0x11   :  { %228 = vmatprep.subr.mxu0 %v320_v0  ;;  %260 = vmatprep.mubr.msk.f32.mxu0 %vm321_vm0, %v320_v0  ;;  %v45_v2 = vld [vmem:[#allocation3 + $0x70] sm:$0xff]  ;;  %v44_v3 = vld [vmem:[#allocation3 + $0x68] sm:$0xff]  ;;  %v43_v4 = vld [vmem:[#allocation3 + $0x60] sm:$0xff]  ;;  %s322_s23 = smov [#allocation6]  }
  0x12   :  { %229 = vmatpush3.xpose.msk.msra.mxu0 %vm49_vm1, %v46_v1  ;;  %v42_v5 = vld [vmem:[#allocation3 + $0x58] sm:$0xff]  ;;  %v41_v6 = vld [vmem:[#allocation3 + $0x50] sm:$0xff]  ;;  %v40_v7 = vld [vmem:[#allocation3 + $0x48] sm:$0xff]  ;;  %s184_s24 = sshll.u32 %s322_s23, 4  ;;  %s185_s24 = int_to_ptr.vmem [resolvable:$true] %s184_s24 }
  0x13   :  { %230 = vmatprep.subr.mxu0 %v320_v0  ;;  %v39_v8 = vld [vmem:[#allocation3 + $0x40] sm:$0xff]  ;;  %v38_v9 = vld [vmem:[#allocation3 + $0x38] sm:$0xff]  ;;  %v37_v10 = vld [vmem:[#allocation3 + $0x30] sm:$0xff]  ;;  %s297_s25 = scalar_lea.vmem %s185_s24, 32  ;;  %p298_p6 = scmp.lt.s32.totalorder %s185_s24, %s185_s24 }
  0x14   :  { %v36_v11 = vld [vmem:[#allocation3 + $0x28] sm:$0xff]  ;;  %v35_v12 = vld [vmem:[#allocation3 + $0x20] sm:$0xff]  ;;  %v34_v13 = vld [vmem:[#allocation3 + $0x18] sm:$0xff] }
  0x15   :  { %v33_v14 = vld [vmem:[#allocation3 + $0x10] sm:$0xff]  ;;  %v32_v15 = vld [vmem:[#allocation3 + $0x8] sm:$0xff]  ;;  %v31_v16 = vld [vmem:[#allocation3] sm:$0xff] }
  0x16   :  { %231 = vmatpush3.xpose.msk.msra.mxu0 %vm49_vm1, %v45_v2  ;;  %v30_v17 = vld [vmem:[%s373_s1] sm:$0x1]  ;;  %s293_s1 = scalar_lea.vmem %s185_s24, 16 }
  0x17   :  { %232 = vmatprep.subr.mxu0 %v320_v0  ;;  %p294_p5 = scmp.ne.s32.totalorder %s185_s24, %s293_s1  ;;  %p299_p7 = scmp.lt.s32.totalorder %s297_s25, %s293_s1 }
  0x19   :  { %p300_p8 = por %p299_p7, %p298_p6 }
  0x1a   :  { %233 = vmatpush3.xpose.msk.msra.mxu0 %vm49_vm1, %v44_v3 }
  0x1b   :  { %234 = vmatprep.subr.mxu0 %v320_v0  ;;  %p301_p9 = pnand %p300_p8, %p294_p5 }
  0x1e   :  { %235 = vmatpush3.xpose.msk.msra.mxu0 %vm49_vm1, %v43_v4 }
  0x1f   :  { %236 = vmatprep.subr.mxu0 %v320_v0 }
  0x22   :  { %237 = vmatpush3.xpose.msk.msra.mxu0 %vm49_vm1, %v42_v5 }
  0x23   :  { %238 = vmatprep.subr.mxu0 %v320_v0 }
  0x26   :  { %239 = vmatpush3.xpose.msk.msra.mxu0 %vm49_vm1, %v41_v6 }
  0x27   :  { %240 = vmatprep.subr.mxu0 %v320_v0 }
  0x2a   :  { %241 = vmatpush3.xpose.msk.msra.mxu0 %vm49_vm1, %v40_v7 }
  0x2b   :  { %242 = vmatprep.subr.mxu0 %v320_v0 }
  0x2e   :  { %243 = vmatpush3.xpose.msk.msra.mxu0 %vm49_vm1, %v39_v8 }
  0x2f   :  { %244 = vmatprep.subr.mxu0 %v320_v0 }
  0x32   :  { %245 = vmatpush3.xpose.msk.msra.mxu0 %vm49_vm1, %v38_v9 }
  0x33   :  { %246 = vmatprep.subr.mxu0 %v320_v0 }
  0x36   :  { %247 = vmatpush3.xpose.msk.msra.mxu0 %vm49_vm1, %v37_v10 }
  0x37   :  { %248 = vmatprep.subr.mxu0 %v320_v0 }
  0x3a   :  { %249 = vmatpush3.xpose.msk.msra.mxu0 %vm49_vm1, %v36_v11 }
  0x3b   :  { %250 = vmatprep.subr.mxu0 %v320_v0 }
  0x3e   :  { %251 = vmatpush3.xpose.msk.msra.mxu0 %vm49_vm1, %v35_v12 }
  0x3f   :  { %252 = vmatprep.subr.mxu0 %v320_v0 }
  0x42   :  { %253 = vmatpush3.xpose.msk.msra.mxu0 %vm49_vm1, %v34_v13 }
  0x43   :  { %254 = vmatprep.subr.mxu0 %v320_v0 }
  0x46   :  { %255 = vmatpush3.xpose.msk.msra.mxu0 %vm49_vm1, %v33_v14 }
  0x47   :  { %256 = vmatprep.subr.mxu0 %v320_v0 }
  0x4a   :  { %257 = vmatpush3.xpose.msk.msra.mxu0 %vm49_vm1, %v32_v15 }
  0x4b   :  { %258 = vmatprep.subr.mxu0 %v320_v0 }
  0x4e   :  { %259 = vmatpush3.xpose.msk.msra.mxu0 %vm49_vm1, %v31_v16 }
  0x51   :  { %261 = vmatmul.mubr.msk.f32.vlgmr.msra.gmra.mxu0 %vm49_vm1, %v30_v17 }
 0x111   :  { %v167_v19 = vpop.f32.mrf.mxu0 }
 0x112   :  { %v168_v20 = vadd.f32 %v167_v19, %v48_v18 }
 0x113   :  { %v262_v21 = vpop.f32.mrf.mxu0 }
 0x114   :  { %v210_v22 = vmul.f32 -1.442695, %v168_v20 }
 0x116   :  { %269 = vpow2.f32 %v210_v22 }
 0x123   :  { %v270_v23 = vpop.eup %269 }
 0x124   :  { %v174_v24 = vadd.f32 1.0, %v270_v23 }
 0x126   :  { %271 = vrcp.f32 %v174_v24 }
 0x133   :  { %v272_v25 = vpop.eup %271 }
 0x134   :  { %177 = vst [vmem:[#allocation6] sm:$0x1] %v272_v25 }
 0x135   :  { %304 = shalt.err (!%p301_p9)
}
 0x136   :  { %187 = dma.vmem_to_hbm [thread:$0]  %s185_s24, 16, %s375_s3, [#allocation5]  }
 0x137   :  { %315 = dma.done.wait [#allocation5], 16  }
 0x138   :  { %316 = vsyncadd [#allocation5], 4294967280 }
 0x139   :  { %191 = vsyncpa [#allocation4], 1 }
 0x13a   :  { %192 = vsyncpa [#allocation5], 1 }

</bundles_post_ra>
